<compile_context>
chip_gen: v6e
topology: v6e:2x2x1
jax: 0.10.0
libtpu: 0.0.40
codegen_flags: <defaults>
</compile_context>

<pallas_src>
import math

import jax
import jax.numpy as jnp
from jax import lax
from jax.experimental import pallas as pl
from jax.experimental.pallas import tpu as pltpu


# --------------------------------------------------------------------------- kernel

def _basic_block_kernel(x_ref, w1_ref, w2_ref, a1_ref, b1_ref, a2_ref, b2_ref,
                        out_ref, xpad_ref, mid_ref):
    """B images per grid step; activations in lane-folded (rows, W*Cp) layout.

    x_ref   : (B, H, W*Cp)           f32  input slabs (also the residual)
    w*_ref  : (3, W*Cp, W*Cp)        bf16 banded conv weights (one mat per ky
              tap; kx taps and horizontal zero padding folded into the bands)
    a*/b*   : (1, W*Cp)              f32  folded BatchNorm scale / bias
    out_ref : (B, H, W*Cp)           f32
    xpad_ref, mid_ref : (B*(H+2), W*Cp) bf16 scratch — the B vertically padded
              conv inputs stacked along rows; the 2 zero halo rows per image
              double as separators, so each 3x3 conv is 3 big MXU matmuls.
    """
    B, H, WC = x_ref.shape
    Hp = H + 2
    M = B * Hp - 2     # rows of conv output computed over the stacked slab

    # Halo rows are re-zeroed every step (2*B tiny bf16 row stores): gating on
    # program_id(0)==0 would be cheaper but is NOT megacore-safe — with
    # dimension_semantics=("parallel",) the second TensorCore never sees step 0
    # and its private scratch would keep garbage halos.
    zero_row = jnp.zeros((1, WC), jnp.bfloat16)
    for b in range(B):
        top = b * Hp
        bot = top + H + 1
        xpad_ref[top:top + 1, :] = zero_row
        xpad_ref[bot:bot + 1, :] = zero_row
        mid_ref[top:top + 1, :] = zero_row
        mid_ref[bot:bot + 1, :] = zero_row
        # conv1 input interior, cast to bf16 once (not once per ky tap).
        xpad_ref[top + 1:top + 1 + H, :] = x_ref[b].astype(jnp.bfloat16)

    def conv3x3(src_ref, w_ref):
        # 3 lane-dense bf16 MXU matmuls (one per ky tap) read straight from the
        # scratch ref; f32 accumulation.  Result row i is the conv output for
        # padded-row i+1 of the stack; rows that straddle two images are
        # garbage and are simply never written back.
        acc = jnp.dot(src_ref[0:M, :], w_ref[0],
                      preferred_element_type=jnp.float32)
        acc = acc + jnp.dot(src_ref[1:M + 1, :], w_ref[1],
                            preferred_element_type=jnp.float32)
        acc = acc + jnp.dot(src_ref[2:M + 2, :], w_ref[2],
                            preferred_element_type=jnp.float32)
        return acc

    # ---- conv1 -> bn1 (folded affine) -> relu --------------------------------
    out1 = conv3x3(xpad_ref, w1_ref)
    out1 = jnp.maximum(out1 * a1_ref[...] + b1_ref[...], 0.0).astype(jnp.bfloat16)
    for b in range(B):
        mid_ref[b * Hp + 1:b * Hp + 1 + H, :] = out1[b * Hp:b * Hp + H, :]

    # ---- conv2 -> bn2 -> residual add -> relu ---------------------------------
    out2 = conv3x3(mid_ref, w2_ref)
    out2 = out2 * a2_ref[...] + b2_ref[...]
    for b in range(B):
        out_ref[b] = jnp.maximum(out2[b * Hp:b * Hp + H, :] + x_ref[b], 0.0)


# ------------------------------------------------------------- parameter folding

def _padded_channels(c, width, lane=128):
    """Smallest Cp >= c such that width*Cp is a multiple of the 128-lane vreg."""
    step = lane // math.gcd(width, lane)
    return max(-(-c // step) * step, step)


def _fold_conv3x3_weight(w_hwio_padded, width):
    """(3, 3, Cp, Cp) HWIO -> (3, width*Cp, width*Cp) banded bf16 matrices.

    Band dx places w[ky, dx+1] at block (x+dx, x); out-of-range x+dx is simply
    absent, which implements the conv's zero padding along W.
    """
    _, _, cin, cout = w_hwio_padded.shape
    mats = []
    for ky in range(3):
        m = jnp.zeros((width * cin, width * cout), jnp.float32)
        for dx in (-1, 0, 1):
            band = jnp.eye(width, width, k=-dx, dtype=jnp.float32)
            m = m + jnp.kron(band, w_hwio_padded[ky, dx + 1].astype(jnp.float32))
        mats.append(m)
    return jnp.stack(mats, axis=0).astype(jnp.bfloat16)


def _fold_batchnorm(bn, width, cp, eps):
    """Inference BatchNorm -> per-channel affine, zero on pad channels, tiled
    onto the (W*Cp) lane axis."""
    gamma, beta, mean, var = bn
    a = gamma / jnp.sqrt(var + eps)
    b = beta - mean * a
    a = jnp.pad(a, (0, cp - a.shape[0]))
    b = jnp.pad(b, (0, cp - b.shape[0]))
    return (jnp.tile(a, width).reshape(1, -1).astype(jnp.float32),
            jnp.tile(b, width).reshape(1, -1).astype(jnp.float32))


def fold_basic_block_params(w1, w2, bn1, bn2, width, eps=1e-5):
    """Build folded (banded bf16 conv weights, BN affine) ONCE at load time.

    w*: (3, 3, Cin, Cout) HWIO.  bn* = (gamma, beta, mean, var), each (Cout,).
    """
    cin, cout = w1.shape[2], w1.shape[3]
    assert w1.shape == (3, 3, cin, cout) and w2.shape == (3, 3, cout, cout)
    assert cin == cout, \
        "default BasicBlock (stride=1, downsample=None) needs inplanes==planes"
    cp = _padded_channels(cout, width)

    def pad_w(w):
        return jnp.pad(w, ((0, 0), (0, 0),
                           (0, cp - w.shape[2]), (0, cp - w.shape[3])))

    w1b = _fold_conv3x3_weight(pad_w(w1), width)
    w2b = _fold_conv3x3_weight(pad_w(w2), width)
    a1, b1 = _fold_batchnorm(bn1, width, cp, eps)
    a2, b2 = _fold_batchnorm(bn2, width, cp, eps)
    return w1b, w2b, a1, b1, a2, b2


# --------------------------------------------------------------------------- wrapper

_VMEM_CAP = None


def _vmem_cap_bytes():
    global _VMEM_CAP
    if _VMEM_CAP is None:
        try:
            _VMEM_CAP = int(pltpu.get_tpu_info().vmem_capacity_bytes)
        except Exception:
            _VMEM_CAP = 64 << 20          # conservative (v7x-sized) fallback
    return _VMEM_CAP


def _pick_image_block(n, max_block=8):
    """Largest B<=max_block dividing n while keeping >=2 grid steps (megacore)."""
    best = 1
    for b in range(1, min(n, max_block) + 1):
        if n % b == 0 and n // b >= 2:
            best = b
    return best


@jax.jit
def basic_block_pallas(x_nhwc, w1b, w2b, a1, b1, a2, b2):
    """x_nhwc: (N, H, W, Cin) f32.  Remaining args from fold_basic_block_params."""
    N, H, W, Cin = x_nhwc.shape
    WC = w1b.shape[1]
    Cp = WC // W
    Hp = H + 2
    B = _pick_image_block(N)

    xp = x_nhwc
    if Cp != Cin:                      # zero-pad channels to make lanes dense
        xp = jnp.pad(x_nhwc, ((0, 0), (0, 0), (0, 0), (0, Cp - Cin)))
    x2d = xp.reshape(N, H, WC)         # lane-folded activation slabs

    resident2 = lambda n: (0, 0)       # weights / BN stay VMEM-resident
    resident3 = lambda n: (0, 0, 0)
    grid_spec = pltpu.PrefetchScalarGridSpec(
        num_scalar_prefetch=0,
        grid=(N // B,),
        in_specs=[
            pl.BlockSpec((B, H, WC), lambda n: (n, 0, 0)),   # x slabs
            pl.BlockSpec((3, WC, WC), resident3),            # conv1 weights
            pl.BlockSpec((3, WC, WC), resident3),            # conv2 weights
            pl.BlockSpec((1, WC), resident2),                # bn1 scale
            pl.BlockSpec((1, WC), resident2),                # bn1 bias
            pl.BlockSpec((1, WC), resident2),                # bn2 scale
            pl.BlockSpec((1, WC), resident2),                # bn2 bias
        ],
        out_specs=pl.BlockSpec((B, H, WC), lambda n: (n, 0, 0)),
        scratch_shapes=[pltpu.VMEM((B * Hp, WC), jnp.bfloat16),  # padded conv1 in
                        pltpu.VMEM((B * Hp, WC), jnp.bfloat16)],  # padded conv2 in
    )

    # Generation-aware VMEM budget (double-buffered slabs + resident weights/BN
    # + bf16 scratch), clamped under the queried per-core VMEM capacity.
    tile_bytes = (2 * B * H * WC * 4          # input slabs, double-buffered (f32)
                  + 2 * B * H * WC * 4        # output slabs, double-buffered (f32)
                  + 2 * 2 * 3 * WC * WC * 2   # banded weights (bf16, 2x buffered)
                  + 2 * 4 * WC * 4            # folded BN params (f32)
                  + 2 * B * Hp * WC * 2)      # bf16 padded-activation scratch
    cap = _vmem_cap_bytes()
    vmem_limit = int(min(max(4 * tile_bytes, 16 << 20), cap - (8 << 20)))

    out2d = pl.pallas_call(
        _basic_block_kernel,
        out_shape=jax.ShapeDtypeStruct((N, H, WC), jnp.float32),
        grid_spec=grid_spec,
        compiler_params=pltpu.CompilerParams(
            dimension_semantics=("parallel",),   # v7x: 2 TCs split the batch grid
            vmem_limit_bytes=vmem_limit),
    )(x2d, w1b, w2b, a1, b1, a2, b2)

    out = out2d.reshape(N, H, W, Cp)
    if Cp != Cin:
        out = out[..., :Cin]                  # drop pad channels (Cout == Cin)
    return out


# ------------------------------------------------------------------------- references

def basic_block_reference(x_nhwc, w1, w2, bn1, bn2, eps=1e-5):
    """Pure-f32 reference; matches PyTorch BasicBlock.forward in eval mode."""
    def bn_apply(y, bn):
        gamma, beta, mean, var = bn
        return (y - mean) / jnp.sqrt(var + eps) * gamma + beta

    dn = ('NHWC', 'HWIO', 'NHWC')
    out = lax.conv_general_dilated(x_nhwc, w1, (1, 1), 'SAME', dimension_numbers=dn)
    out = jnp.maximum(bn_apply(out, bn1), 0.0)
    out = lax.conv_general_dilated(out, w2, (1, 1), 'SAME', dimension_numbers=dn)
    out = bn_apply(out, bn2) + x_nhwc
    return jnp.maximum(out, 0.0)


def basic_block_mixed_reference(x_nhwc, w1, w2, bn1, bn2, eps=1e-5):
    """Reference mirroring the kernel's precision: bf16 conv operands,
    f32 accumulation, f32 folded-BN affine / residual / ReLU."""
    def fold(bn):
        gamma, beta, mean, var = bn
        a = gamma / jnp.sqrt(var + eps)
        return a, beta - mean * a

    a1, b1 = fold(bn1)
    a2, b2 = fold(bn2)
    dn = ('NHWC', 'HWIO', 'NHWC')

    def conv(y, w):
        return lax.conv_general_dilated(
            y.astype(jnp.bfloat16), w.astype(jnp.bfloat16), (1, 1), 'SAME',
            dimension_numbers=dn, preferred_element_type=jnp.float32)

    out = jnp.maximum(conv(x_nhwc, w1) * a1 + b1, 0.0)
    out = conv(out, w2) * a2 + b2
    return jnp.maximum(out + x_nhwc, 0.0)


# ------------------------------------------------------------------------------- main

if __name__ == "__main__":
    key = jax.random.PRNGKey(0)
    N, C, H, W = 2, 4, 16, 16          # inplanes = planes = 4, stride = 1

    k = jax.random.split(key, 8)
    # PyTorch-side input would be NCHW; build it that way, then go channels-last.
    x_nchw = jax.random.normal(k[0], (N, C, H, W), jnp.float32)
    x_nhwc = jnp.transpose(x_nchw, (0, 2, 3, 1))

    # conv3x3 weights (bias=False), HWIO layout.
    w1 = jax.random.normal(k[1], (3, 3, C, C), jnp.float32) * 0.1
    w2 = jax.random.normal(k[2], (3, 3, C, C), jnp.float32) * 0.1

    # BatchNorm params (gamma, beta, running_mean, running_var > 0).
    bn1 = (1.0 + 0.1 * jax.random.normal(k[3], (C,), jnp.float32),
           0.1 * jax.random.normal(k[4], (C,), jnp.float32),
           0.1 * jax.random.normal(k[5], (C,), jnp.float32),
           jnp.abs(jax.random.normal(k[6], (C,), jnp.float32)) + 0.5)
    bn2 = (1.0 + 0.1 * jax.random.normal(k[7], (C,), jnp.float32),
           0.05 * jnp.ones((C,), jnp.float32),
           -0.05 * jnp.ones((C,), jnp.float32),
           jnp.ones((C,), jnp.float32))

    # Fold weights / BN once (model-load time), outside the per-call jit path.
    params = fold_basic_block_params(w1, w2, bn1, bn2, W)
    params = jax.tree_util.tree_map(jax.block_until_ready, params)

    out = basic_block_pallas(x_nhwc, *params)
    out = jax.block_until_ready(out)
    assert out.shape == (N, H, W, C)

    # Tight check vs a reference with identical precision handling (bf16 MXU
    # operands, f32 accumulation) — catches structural/tap/BN/padding mistakes.
    ref_mixed = basic_block_mixed_reference(x_nhwc, w1, w2, bn1, bn2)
    assert jnp.allclose(out, ref_mixed, atol=2e-3, rtol=2e-3), \
        "mismatch vs mixed-precision reference"

    # Semantic check vs the pure-f32 PyTorch-equivalent reference (tolerance
    # accounts for bf16 rounding of conv operands).
    ref_f32 = basic_block_reference(x_nhwc, w1, w2, bn1, bn2)
    assert jnp.allclose(out, ref_f32, atol=3e-2, rtol=3e-2), \
        "mismatch vs f32 reference"

    # Also exercise the multi-image-per-grid-step path (B=4, grid=2) at N=8.
    x8 = jax.random.normal(jax.random.PRNGKey(1), (8, H, W, C), jnp.float32)
    out8 = jax.block_until_ready(basic_block_pallas(x8, *params))
    ref8 = basic_block_mixed_reference(x8, w1, w2, bn1, bn2)
    assert jnp.allclose(out8, ref8, atol=2e-3, rtol=2e-3), \
        "mismatch vs mixed-precision reference (batched path)"

    print("KERNEL_OK")
</pallas_src>

<mosaic_0001>
module attributes {stable_mosaic.version = 11 : i64} {
  func.func @_basic_block_kernel(%arg0: i32, %arg1: memref<1x16x128xf32, #tpu.memory_space<vmem>>, %arg2: memref<3x128x128xbf16, #tpu.memory_space<vmem>>, %arg3: memref<3x128x128xbf16, #tpu.memory_space<vmem>>, %arg4: memref<1x128xf32, #tpu.memory_space<vmem>>, %arg5: memref<1x128xf32, #tpu.memory_space<vmem>>, %arg6: memref<1x128xf32, #tpu.memory_space<vmem>>, %arg7: memref<1x128xf32, #tpu.memory_space<vmem>>, %arg8: memref<1x16x128xf32, #tpu.memory_space<vmem>>, %arg9: memref<18x128xbf16, #tpu.memory_space<vmem>>, %arg10: memref<18x128xbf16, #tpu.memory_space<vmem>>) attributes {dimension_semantics = [#tpu.dimension_semantics<parallel>], iteration_bounds = array<i64: 2>, scalar_prefetch = 0 : i64, scratch_operands = 2 : i64, tpu.core_type = #tpu.core_type<tc>, window_params = [{transform_indices = @transform_0, window_bounds = array<i64: 1, 16, 128>}, {pipeline_mode = #tpu.pipeline_mode<synchronous>, transform_indices = @transform_1, window_bounds = array<i64: 3, 128, 128>}, {pipeline_mode = #tpu.pipeline_mode<synchronous>, transform_indices = @transform_2, window_bounds = array<i64: 3, 128, 128>}, {pipeline_mode = #tpu.pipeline_mode<synchronous>, transform_indices = @transform_3, window_bounds = array<i64: 1, 128>}, {pipeline_mode = #tpu.pipeline_mode<synchronous>, transform_indices = @transform_4, window_bounds = array<i64: 1, 128>}, {pipeline_mode = #tpu.pipeline_mode<synchronous>, transform_indices = @transform_5, window_bounds = array<i64: 1, 128>}, {pipeline_mode = #tpu.pipeline_mode<synchronous>, transform_indices = @transform_6, window_bounds = array<i64: 1, 128>}, {transform_indices = @transform_7, window_bounds = array<i64: 1, 16, 128>}]} {
    %cst = arith.constant 0.000000e+00 : bf16
    %0 = vector.broadcast %cst : bf16 to vector<1x128xbf16>
    %c0 = arith.constant 0 : index
    %c0_0 = arith.constant 0 : index
    %1 = vector.load %arg9[%c0, %c0_0] : memref<18x128xbf16, #tpu.memory_space<vmem>>, vector<1x128xbf16>
    tpu.vector_store %arg9[%c0, %c0_0], %0 {strides = array<i32>} : memref<18x128xbf16, #tpu.memory_space<vmem>>, vector<1x128xbf16>,
    %c17 = arith.constant 17 : index
    %c0_1 = arith.constant 0 : index
    %2 = vector.load %arg9[%c17, %c0_1] : memref<18x128xbf16, #tpu.memory_space<vmem>>, vector<1x128xbf16>
    tpu.vector_store %arg9[%c17, %c0_1], %0 {strides = array<i32>} : memref<18x128xbf16, #tpu.memory_space<vmem>>, vector<1x128xbf16>,
    %c0_2 = arith.constant 0 : index
    %c0_3 = arith.constant 0 : index
    %3 = vector.load %arg10[%c0_2, %c0_3] : memref<18x128xbf16, #tpu.memory_space<vmem>>, vector<1x128xbf16>
    tpu.vector_store %arg10[%c0_2, %c0_3], %0 {strides = array<i32>} : memref<18x128xbf16, #tpu.memory_space<vmem>>, vector<1x128xbf16>,
    %c17_4 = arith.constant 17 : index
    %c0_5 = arith.constant 0 : index
    %4 = vector.load %arg10[%c17_4, %c0_5] : memref<18x128xbf16, #tpu.memory_space<vmem>>, vector<1x128xbf16>
    tpu.vector_store %arg10[%c17_4, %c0_5], %0 {strides = array<i32>} : memref<18x128xbf16, #tpu.memory_space<vmem>>, vector<1x128xbf16>,
    %c0_6 = arith.constant 0 : index
    %c0_7 = arith.constant 0 : index
    %c0_8 = arith.constant 0 : index
    %5 = vector.load %arg1[%c0_6, %c0_7, %c0_8] : memref<1x16x128xf32, #tpu.memory_space<vmem>>, vector<1x16x128xf32>
    %6 = vector.shape_cast %5 : vector<1x16x128xf32> to vector<16x128xf32>
    %7 = arith.truncf %6 : vector<16x128xf32> to vector<16x128xbf16>
    %c1 = arith.constant 1 : index
    %c0_9 = arith.constant 0 : index
    %8 = vector.load %arg9[%c1, %c0_9] : memref<18x128xbf16, #tpu.memory_space<vmem>>, vector<16x128xbf16>
    tpu.vector_store %arg9[%c1, %c0_9], %7 {strides = array<i32>} : memref<18x128xbf16, #tpu.memory_space<vmem>>, vector<16x128xbf16>,
    %c0_10 = arith.constant 0 : index
    %c0_11 = arith.constant 0 : index
    %9 = vector.load %arg9[%c0_10, %c0_11] : memref<18x128xbf16, #tpu.memory_space<vmem>>, vector<16x128xbf16>
    %c0_12 = arith.constant 0 : index
    %c0_13 = arith.constant 0 : index
    %c0_14 = arith.constant 0 : index
    %10 = vector.load %arg2[%c0_12, %c0_13, %c0_14] : memref<3x128x128xbf16, #tpu.memory_space<vmem>>, vector<1x128x128xbf16>
    %11 = vector.shape_cast %10 : vector<1x128x128xbf16> to vector<128x128xbf16>
    %cst_15 = arith.constant dense<0.000000e+00> : vector<16x128xf32>
    %12 = tpu.matmul %9, %11, %cst_15 {dimension_numbers = #tpu.dot_dimension_numbers<[1], [0], [0], [1], [0, 0, 1, 1], [], []>} : vector<16x128xbf16>, vector<128x128xbf16>, vector<16x128xf32> -> vector<16x128xf32>
    %c1_16 = arith.constant 1 : index
    %c0_17 = arith.constant 0 : index
    %13 = vector.load %arg9[%c1_16, %c0_17] : memref<18x128xbf16, #tpu.memory_space<vmem>>, vector<16x128xbf16>
    %c1_18 = arith.constant 1 : index
    %c0_19 = arith.constant 0 : index
    %c0_20 = arith.constant 0 : index
    %14 = vector.load %arg2[%c1_18, %c0_19, %c0_20] : memref<3x128x128xbf16, #tpu.memory_space<vmem>>, vector<1x128x128xbf16>
    %15 = vector.shape_cast %14 : vector<1x128x128xbf16> to vector<128x128xbf16>
    %cst_21 = arith.constant dense<0.000000e+00> : vector<16x128xf32>
    %16 = tpu.matmul %13, %15, %cst_21 {dimension_numbers = #tpu.dot_dimension_numbers<[1], [0], [0], [1], [0, 0, 1, 1], [], []>} : vector<16x128xbf16>, vector<128x128xbf16>, vector<16x128xf32> -> vector<16x128xf32>
    %17 = arith.addf %12, %16 : vector<16x128xf32>
    %c2 = arith.constant 2 : index
    %c0_22 = arith.constant 0 : index
    %18 = vector.load %arg9[%c2, %c0_22] : memref<18x128xbf16, #tpu.memory_space<vmem>>, vector<16x128xbf16>
    %c2_23 = arith.constant 2 : index
    %c0_24 = arith.constant 0 : index
    %c0_25 = arith.constant 0 : index
    %19 = vector.load %arg2[%c2_23, %c0_24, %c0_25] : memref<3x128x128xbf16, #tpu.memory_space<vmem>>, vector<1x128x128xbf16>
    %20 = vector.shape_cast %19 : vector<1x128x128xbf16> to vector<128x128xbf16>
    %cst_26 = arith.constant dense<0.000000e+00> : vector<16x128xf32>
    %21 = tpu.matmul %18, %20, %cst_26 {dimension_numbers = #tpu.dot_dimension_numbers<[1], [0], [0], [1], [0, 0, 1, 1], [], []>} : vector<16x128xbf16>, vector<128x128xbf16>, vector<16x128xf32> -> vector<16x128xf32>
    %22 = arith.addf %17, %21 : vector<16x128xf32>
    %c0_27 = arith.constant 0 : index
    %c0_28 = arith.constant 0 : index
    %23 = vector.load %arg4[%c0_27, %c0_28] : memref<1x128xf32, #tpu.memory_space<vmem>>, vector<1x128xf32>
    %24 = vector.broadcast %23 : vector<1x128xf32> to vector<16x128xf32>
    %25 = arith.mulf %22, %24 : vector<16x128xf32>
    %c0_29 = arith.constant 0 : index
    %c0_30 = arith.constant 0 : index
    %26 = vector.load %arg5[%c0_29, %c0_30] : memref<1x128xf32, #tpu.memory_space<vmem>>, vector<1x128xf32>
    %27 = vector.broadcast %26 : vector<1x128xf32> to vector<16x128xf32>
    %28 = arith.addf %25, %27 : vector<16x128xf32>
    %cst_31 = arith.constant 0.000000e+00 : f32
    %29 = vector.broadcast %cst_31 : f32 to vector<16x128xf32>
    %30 = arith.maximumf %28, %29 : vector<16x128xf32>
    %31 = arith.truncf %30 : vector<16x128xf32> to vector<16x128xbf16>
    %c1_32 = arith.constant 1 : index
    %c0_33 = arith.constant 0 : index
    %32 = vector.load %arg10[%c1_32, %c0_33] : memref<18x128xbf16, #tpu.memory_space<vmem>>, vector<16x128xbf16>
    tpu.vector_store %arg10[%c1_32, %c0_33], %31 {strides = array<i32>} : memref<18x128xbf16, #tpu.memory_space<vmem>>, vector<16x128xbf16>,
    %c0_34 = arith.constant 0 : index
    %c0_35 = arith.constant 0 : index
    %33 = vector.load %arg10[%c0_34, %c0_35] : memref<18x128xbf16, #tpu.memory_space<vmem>>, vector<16x128xbf16>
    %c0_36 = arith.constant 0 : index
    %c0_37 = arith.constant 0 : index
    %c0_38 = arith.constant 0 : index
    %34 = vector.load %arg3[%c0_36, %c0_37, %c0_38] : memref<3x128x128xbf16, #tpu.memory_space<vmem>>, vector<1x128x128xbf16>
    %35 = vector.shape_cast %34 : vector<1x128x128xbf16> to vector<128x128xbf16>
    %cst_39 = arith.constant dense<0.000000e+00> : vector<16x128xf32>
    %36 = tpu.matmul %33, %35, %cst_39 {dimension_numbers = #tpu.dot_dimension_numbers<[1], [0], [0], [1], [0, 0, 1, 1], [], []>} : vector<16x128xbf16>, vector<128x128xbf16>, vector<16x128xf32> -> vector<16x128xf32>
    %c1_40 = arith.constant 1 : index
    %c0_41 = arith.constant 0 : index
    %37 = vector.load %arg10[%c1_40, %c0_41] : memref<18x128xbf16, #tpu.memory_space<vmem>>, vector<16x128xbf16>
    %c1_42 = arith.constant 1 : index
    %c0_43 = arith.constant 0 : index
    %c0_44 = arith.constant 0 : index
    %38 = vector.load %arg3[%c1_42, %c0_43, %c0_44] : memref<3x128x128xbf16, #tpu.memory_space<vmem>>, vector<1x128x128xbf16>
    %39 = vector.shape_cast %38 : vector<1x128x128xbf16> to vector<128x128xbf16>
    %cst_45 = arith.constant dense<0.000000e+00> : vector<16x128xf32>
    %40 = tpu.matmul %37, %39, %cst_45 {dimension_numbers = #tpu.dot_dimension_numbers<[1], [0], [0], [1], [0, 0, 1, 1], [], []>} : vector<16x128xbf16>, vector<128x128xbf16>, vector<16x128xf32> -> vector<16x128xf32>
    %41 = arith.addf %36, %40 : vector<16x128xf32>
    %c2_46 = arith.constant 2 : index
    %c0_47 = arith.constant 0 : index
    %42 = vector.load %arg10[%c2_46, %c0_47] : memref<18x128xbf16, #tpu.memory_space<vmem>>, vector<16x128xbf16>
    %c2_48 = arith.constant 2 : index
    %c0_49 = arith.constant 0 : index
    %c0_50 = arith.constant 0 : index
    %43 = vector.load %arg3[%c2_48, %c0_49, %c0_50] : memref<3x128x128xbf16, #tpu.memory_space<vmem>>, vector<1x128x128xbf16>
    %44 = vector.shape_cast %43 : vector<1x128x128xbf16> to vector<128x128xbf16>
    %cst_51 = arith.constant dense<0.000000e+00> : vector<16x128xf32>
    %45 = tpu.matmul %42, %44, %cst_51 {dimension_numbers = #tpu.dot_dimension_numbers<[1], [0], [0], [1], [0, 0, 1, 1], [], []>} : vector<16x128xbf16>, vector<128x128xbf16>, vector<16x128xf32> -> vector<16x128xf32>
    %46 = arith.addf %41, %45 : vector<16x128xf32>
    %c0_52 = arith.constant 0 : index
    %c0_53 = arith.constant 0 : index
    %47 = vector.load %arg6[%c0_52, %c0_53] : memref<1x128xf32, #tpu.memory_space<vmem>>, vector<1x128xf32>
    %48 = vector.broadcast %47 : vector<1x128xf32> to vector<16x128xf32>
    %49 = arith.mulf %46, %48 : vector<16x128xf32>
    %c0_54 = arith.constant 0 : index
    %c0_55 = arith.constant 0 : index
    %50 = vector.load %arg7[%c0_54, %c0_55] : memref<1x128xf32, #tpu.memory_space<vmem>>, vector<1x128xf32>
    %51 = vector.broadcast %50 : vector<1x128xf32> to vector<16x128xf32>
    %52 = arith.addf %49, %51 : vector<16x128xf32>
    %c0_56 = arith.constant 0 : index
    %c0_57 = arith.constant 0 : index
    %c0_58 = arith.constant 0 : index
    %53 = vector.load %arg1[%c0_56, %c0_57, %c0_58] : memref<1x16x128xf32, #tpu.memory_space<vmem>>, vector<1x16x128xf32>
    %54 = vector.shape_cast %53 : vector<1x16x128xf32> to vector<16x128xf32>
    %55 = arith.addf %52, %54 : vector<16x128xf32>
    %cst_59 = arith.constant 0.000000e+00 : f32
    %56 = vector.broadcast %cst_59 : f32 to vector<16x128xf32>
    %57 = arith.maximumf %55, %56 : vector<16x128xf32>
    %c0_60 = arith.constant 0 : index
    %c0_61 = arith.constant 0 : index
    %c0_62 = arith.constant 0 : index
    %58 = vector.load %arg8[%c0_60, %c0_61, %c0_62] : memref<1x16x128xf32, #tpu.memory_space<vmem>>, vector<1x16x128xf32>
    %59 = vector.shape_cast %58 : vector<1x16x128xf32> to vector<16x128xf32>
    %60 = vector.shape_cast %57 : vector<16x128xf32> to vector<1x16x128xf32>
    tpu.vector_store %arg8[%c0_60, %c0_61, %c0_62], %60 {strides = array<i32>} : memref<1x16x128xf32, #tpu.memory_space<vmem>>, vector<1x16x128xf32>,
    return
  }
  func.func @transform_0(%arg0: i32) -> (i32, i32, i32) {
    %c0_i32 = arith.constant 0 : i32
    %c0_i32_0 = arith.constant 0 : i32
    %c0_i32_1 = arith.constant 0 : i32
    return %arg0, %c0_i32, %c0_i32_0 : i32, i32, i32
  }
  func.func @transform_1(%arg0: i32) -> (i32, i32, i32) {
    %c0_i32 = arith.constant 0 : i32
    %c0_i32_0 = arith.constant 0 : i32
    %c0_i32_1 = arith.constant 0 : i32
    %c0_i32_2 = arith.constant 0 : i32
    return %c0_i32, %c0_i32_0, %c0_i32_1 : i32, i32, i32
  }
  func.func @transform_2(%arg0: i32) -> (i32, i32, i32) {
    %c0_i32 = arith.constant 0 : i32
    %c0_i32_0 = arith.constant 0 : i32
    %c0_i32_1 = arith.constant 0 : i32
    %c0_i32_2 = arith.constant 0 : i32
    return %c0_i32, %c0_i32_0, %c0_i32_1 : i32, i32, i32
  }
  func.func @transform_3(%arg0: i32) -> (i32, i32) {
    %c0_i32 = arith.constant 0 : i32
    %c0_i32_0 = arith.constant 0 : i32
    %c0_i32_1 = arith.constant 0 : i32
    return %c0_i32, %c0_i32_0 : i32, i32
  }
  func.func @transform_4(%arg0: i32) -> (i32, i32) {
    %c0_i32 = arith.constant 0 : i32
    %c0_i32_0 = arith.constant 0 : i32
    %c0_i32_1 = arith.constant 0 : i32
    return %c0_i32, %c0_i32_0 : i32, i32
  }
  func.func @transform_5(%arg0: i32) -> (i32, i32) {
    %c0_i32 = arith.constant 0 : i32
    %c0_i32_0 = arith.constant 0 : i32
    %c0_i32_1 = arith.constant 0 : i32
    return %c0_i32, %c0_i32_0 : i32, i32
  }
  func.func @transform_6(%arg0: i32) -> (i32, i32) {
    %c0_i32 = arith.constant 0 : i32
    %c0_i32_0 = arith.constant 0 : i32
    %c0_i32_1 = arith.constant 0 : i32
    return %c0_i32, %c0_i32_0 : i32, i32
  }
  func.func @transform_7(%arg0: i32) -> (i32, i32, i32) {
    %c0_i32 = arith.constant 0 : i32
    %c0_i32_0 = arith.constant 0 : i32
    %c0_i32_1 = arith.constant 0 : i32
    return %arg0, %c0_i32, %c0_i32_0 : i32, i32, i32
  }
}

</mosaic_0001>

<bundles_post_ra>
// kernel: basic_block_pallas.1
= control target key start
LH: loop header
LB: loop body
LE: loop exit
PB: predicated region body
PF: predicated region fallthrough
CT: control target
= control target key end

     0   :  { %s1607_s24 = smov 0   ;;  %s1901_s0 = inlined_call_operand.vmem [shape: f32[2,16,128], index: 0, kind: input, shape index: {}]   ;;  %s1902_s1 = inlined_call_operand.vmem [shape: bf16[3,128,128], index: 1, kind: input, shape index: {}]   ;;  %s1903_s2 = inlined_call_operand.vmem [shape: bf16[3,128,128], index: 2, kind: input, shape index: {}]   ;;  %s1904_s3 = inlined_call_operand.vmem [shape: f32[1,128], index: 3, kind: input, shape index: {}]   ;;  %s1905_s4 = inlined_call_operand.vmem [shape: f32[1,128], index: 4, kind: input, shape index: {}]   ;;  %s1906_s5 = inlined_call_operand.vmem [shape: f32[1,128], index: 5, kind: input, shape index: {}]   ;;  %s1907_s6 = inlined_call_operand.vmem [shape: f32[1,128], index: 6, kind: input, shape index: {}]   ;;  %s1908_s7 = inlined_call_operand.vmem [shape: f32[2,16,128], index: 7, kind: output, shape index: {}]  }
   0x1 LB: > { %s1176_s25 = sadd.s32 4294967295, %s1563_s24   ;;  %p1180_p0 = scmp.ge.s32.totalorder %s1563_s24, 1  ;;  %s1563_s24 = sphi %s1607_s24, %s17_s24  }
   0x2   : > { %p237_p1 = scmp.lt.s32.totalorder %s1563_s24, 3 }
   0x4   : > { %p238_p2 = pnand %p1180_p0, %p237_p1 }
   0x5   : > { %p269_p3 = scmp.lt.s32.totalorder (!%p238_p2), %s1176_s25, 1 }
   0x6   : > { %241 = sbr.rel (%p238_p2) target bundleno = 547 (0x223), region = 48 }
   0xb   : > { %v1503_v0 = vld [vmem:[%s1902_s1 + $0x78] sm:$0xff]   ;;  %v1565_v1 = vmov 0.0   ;;  %v1505_v3 = vld [vmem:[%s1902_s1 + $0x70] sm:$0xff]   ;;  %vm1566_vm0 = vmmov 0   ;;  %v1507_v5 = vld [vmem:[%s1902_s1 + $0x68] sm:$0xff]   ;;  %s1918_s25 = smov (!%p269_p3, %s1176_s25), 1 }
   0xc   : > { %1373 = vmatprep.subr.bf16.mxu0 %v1565_v1  ;;  %1393 = vmatprep.subr.bf16.mxu1 %v1565_v1  ;;  %v1504_v2 = vld [vmem:[%s1902_s1 + $0x38] sm:$0xff]   ;;  %v1506_v4 = vld [vmem:[%s1902_s1 + $0x30] sm:$0xff]   ;;  %v1508_v6 = vld [vmem:[%s1902_s1 + $0x28] sm:$0xff]   ;;  %s1313_s19 = sshll.u32 %s1918_s25, 4  ;;  %vm280_vm1 = vcmask 1040384   ;;  %vm327_vm7 = vcmask 1043456  }
   0xd   : > { %1374 = vmatpush3.bf16.msra.mxu0 %v1503_v0  ;;  %1389 = vmatprep.mubr.msk.bf16.mxu0 %vm1566_vm0, %v1565_v1  ;;  %v1509_v7 = vld [vmem:[%s1902_s1 + $0x60] sm:$0xff]   ;;  %v1511_v9 = vld [vmem:[%s1902_s1 + $0x58] sm:$0xff]   ;;  %s273_s26 = scalar_lea.vmem %s1901_s0, %s1313_s19  ;;  %v1513_v11 = vld [vmem:[%s1902_s1 + $0x50] sm:$0xff]   ;;  %vm281_vm2 = vsmask.f32 256  ;;  %vm594_vm11 = vcmask 1046528   ;;  %s278_s12 = scalar_lea.vmem %s1908_s7, %s1313_s19 }
   0xe   : > { %1394 = vmatpush3.bf16.msra.mxu1 %v1504_v2  ;;  %1375 = vmatprep.subr.bf16.mxu0 %v1565_v1  ;;  %v1510_v8 = vld [vmem:[%s1902_s1 + $0x20] sm:$0xff]   ;;  %v1512_v10 = vld [vmem:[%s1902_s1 + $0x18] sm:$0xff]   ;;  %vm286_vm3 = vsmask.f32 7938  ;;  %vm1671_vm4 = vmand %vm280_vm1, %vm281_vm2  ;;  %vm305_vm6 = vsmask.f32 4368 }
   0xf   : > { %1395 = vmatprep.subr.bf16.mxu1 %v1565_v1  ;;  %1409 = vmatprep.mubr.msk.bf16.mxu1 %vm1566_vm0, %v1565_v1  ;;  %v283_v12 = vld [vmem:[#allocation2] sm:$0x1]  ;;  %v288_v14 = vld [vmem:[#allocation2 + $0x8] sm:$0x1]  ;;  %vm1680_vm5 = vmand %vm280_vm1, %vm286_vm3  ;;  %vm380_vm10 = vsmask.f32 7424 }
  0x10   : > { %v1675_v15 = vld [vmem:[%s273_s26] sm:$0xff]  ;;  %v284_v16 = vsel %vm1671_vm4, 0, %v283_v12  ;;  %v1684_v18 = vld [vmem:[%s273_s26 + $0x8] sm:$0xff]  ;;  %v1514_v20 = vld [vmem:[%s1902_s1 + $0x10] sm:$0xff]   ;;  %v289_v21 = vsel %vm1680_vm5, 0, %v288_v14 }
  0x11   : > { %1376 = vmatpush3.bf16.msra.mxu0 %v1505_v3  ;;  %v1315_v19 = vpack.c.bf16 %v1675_v15, %v1675_v15  ;;  %285 = vst [vmem:[#allocation2] sm:$0x1] %v284_v16  ;;  %v1316_v22 = vpack.c.bf16 %v1684_v18, %v1684_v18  ;;  %290 = vst [vmem:[#allocation2 + $0x8] sm:$0x1] %v289_v21  ;;  %v1515_v25 = vld [vmem:[%s1902_s1 + $0x48] sm:$0xff]   ;;  %v1517_v35 = vld [vmem:[%s1902_s1 + $0x40] sm:$0xff]  }
  0x12   : > { %1396 = vmatpush3.bf16.msra.mxu1 %v1506_v4  ;;  %1377 = vmatprep.subr.bf16.mxu0 %v1565_v1  ;;  %v1516_v28 = vld [vmem:[%s1902_s1 + $0x8] sm:$0xff]   ;;  %vm1705_vm8 = vmor %vm281_vm2, %vm305_vm6  ;;  %v1518_v39 = vld [vmem:[%s1902_s1] sm:$0xff]  }
  0x13   : > { %1397 = vmatprep.subr.bf16.mxu1 %v1565_v1  ;;  %v308_v23 = vshrl.u32 %v1315_v19, 16  ;;  %v311_v24 = vshll.u32 %v1315_v19, 16  ;;  %v316_v26 = vshrl.u32 %v1316_v22, 16  ;;  %v319_v27 = vshll.u32 %v1316_v22, 16  ;;  %vm1711_vm9 = vmand %vm327_vm7, %vm286_vm3  ;;  %v1521_v53 = vld [vmem:[%s1902_s1 + $0xb8] sm:$0xff]   ;;  %v1522_v56 = vld [vmem:[%s1902_s1 + $0xb0] sm:$0xff]  }
  0x14   : > { %v1523_v57 = vld [vmem:[%s1902_s1 + $0xa8] sm:$0xff]   ;;  %v1524_v58 = vld [vmem:[%s1902_s1 + $0xa0] sm:$0xff]   ;;  %v1525_v59 = vld [vmem:[%s1902_s1 + $0x98] sm:$0xff]  }
  0x15   : > { %1378 = vmatpush3.bf16.msra.mxu0 %v1507_v5  ;;  %v310_v29 = vrot.slane %v308_v23, 7  ;;  %v318_v31 = vrot.slane %v316_v26, 7  ;;  %v1526_v60 = vld [vmem:[%s1902_s1 + $0x90] sm:$0xff]   ;;  %v1527_v62 = vld [vmem:[%s1902_s1 + $0x88] sm:$0xff]   ;;  %v1528_v0 = vld [vmem:[%s1902_s1 + $0x80] sm:$0xff]  }
  0x16   : > { %1398 = vmatpush3.bf16.msra.mxu1 %v1508_v6  ;;  %1379 = vmatprep.subr.bf16.mxu0 %v1565_v1  ;;  %v291_v5 = vld [vmem:[#allocation3] sm:$0x1]  ;;  %v294_v12 = vld [vmem:[#allocation3 + $0x8] sm:$0x1]  ;;  %v1535_v14 = vld [vmem:[%s1903_s2 + $0x20] sm:$0xff]  }
  0x17   : > { %1399 = vmatprep.subr.bf16.mxu1 %v1565_v1  ;;  %v313_v32 = vor.u32 %v311_v24, %v310_v29  ;;  %v314_v33 = vrot.slane %v310_v29, 4  ;;  %v321_v36 = vor.u32 %v319_v27, %v318_v31  ;;  %v323_v37 = vrot.slane %v318_v31, 4  ;;  %v1536_v19 = vld [vmem:[%s1903_s2 + $0x68] sm:$0xff]   ;;  %v1538_v17 = vld [vmem:[%s1903_s2 + $0x60] sm:$0xff]   ;;  %v1539_v21 = vld [vmem:[%s1903_s2 + $0x10] sm:$0xff]  }
  0x18   : > { %v329_v38 = vld [vmem:[#allocation2] sm:$0xf]  ;;  %v333_v42 = vld [vmem:[#allocation2 + $0x8] sm:$0x1]  ;;  %v292_v6 = vsel %vm1671_vm4, 0, %v291_v5  ;;  %v295_v16 = vsel %vm1680_vm5, 0, %v294_v12 }
  0x19   : > { %1380 = vmatpush3.bf16.msra.mxu0 %v1509_v7  ;;  %v322_v40 = vsel %vm1705_vm8, %v314_v33, %v321_v36  ;;  %v330_v41 = vsel %vm1711_vm9, %v313_v32, %v329_v38  ;;  %v334_v43 = vsel %vm1671_vm4, %v323_v37, %v333_v42  ;;  %293 = vst [vmem:[#allocation3] sm:$0x1] %v292_v6  ;;  %v1530_v7 = vld [vmem:[%s1903_s2 + $0x38] sm:$0xff]   ;;  %296 = vst [vmem:[#allocation3 + $0x8] sm:$0x1] %v295_v16  ;;  %v1541_v23 = vld [vmem:[%s1903_s2 + $0x8] sm:$0xff]  }
  0x1a   : > { %1400 = vmatpush3.bf16.msra.mxu1 %v1510_v8  ;;  %1381 = vmatprep.subr.bf16.mxu0 %v1565_v1  ;;  %331 = vst [vmem:[#allocation2] sm:$0xf] %v330_v41  ;;  %332 = vst [vmem:[#allocation2 + $0x4] sm:$0xf] %v322_v40  ;;  %v1531_v8 = vld [vmem:[%s1903_s2 + $0x30] sm:$0xff]   ;;  %v1540_v22 = vld [vmem:[%s1903_s2 + $0x58] sm:$0xff]  }
  0x1b   : > { %1401 = vmatprep.subr.bf16.mxu1 %v1565_v1  ;;  %335 = vst [vmem:[#allocation2 + $0x8] sm:$0x1] %v334_v43  ;;  %v1542_v24 = vld [vmem:[%s1903_s2 + $0x50] sm:$0xff]   ;;  %v1544_v26 = vld [vmem:[%s1903_s2 + $0x48] sm:$0xff]   ;;  %v1546_v27 = vld [vmem:[%s1903_s2 + $0x40] sm:$0xff]  }
  0x1c   : > { %v1246_v40 = vld [vmem:[%s1904_s3] ss:$0 sm:$0xff]  ;;  %v1548_v30 = vld [vmem:[%s1903_s2 + $0xb8] sm:$0xff]  }
  0x1d   : > { %1382 = vmatpush3.bf16.msra.mxu0 %v1511_v9  ;;  %v1532_v9 = vld [vmem:[%s1903_s2 + $0x78] sm:$0xff]   ;;  %v1247_v42 = vld [vmem:[%s1905_s4] ss:$0 sm:$0xff] }
  0x1e   : > { %1402 = vmatpush3.bf16.msra.mxu1 %v1512_v10  ;;  %1383 = vmatprep.subr.bf16.mxu0 %v1565_v1  ;;  %v1533_v10 = vld [vmem:[%s1903_s2 + $0x28] sm:$0xff]  }
  0x1f   : > { %1403 = vmatprep.subr.bf16.mxu1 %v1565_v1 }
  0x21   : > { %1384 = vmatpush3.bf16.msra.mxu0 %v1513_v11  ;;  %v336_v44 = vld [vmem:[#allocation2] sm:$0xf]  ;;  %v337_v45 = vld [vmem:[#allocation2 + $0x4] sm:$0xf]  ;;  %v1534_v11 = vld [vmem:[%s1903_s2 + $0x70] sm:$0xff]  }
  0x22   : > { %1404 = vmatpush3.bf16.msra.mxu1 %v1514_v20  ;;  %1385 = vmatprep.subr.bf16.mxu0 %v1565_v1  ;;  %v1203_v46 = vcombine.low %v336_v44, %v337_v45  ;;  %v1520_v47 = vld [vmem:[#allocation2 + $0x8] ss:$0 sps:$4 sm:$0x11]   ;;  %v573_v61 = vld [vmem:[#allocation2] sm:$0xe]  ;;  %v1537_v20 = vld [vmem:[%s1903_s2 + $0x18] sm:$0xff]  }
  0x23   : > { %1405 = vmatprep.subr.bf16.mxu1 %v1565_v1  ;;  %v389_v50 = vshll.u32 %v1520_v47, 16  ;;  %v1237_v63 = vcombine.low %v573_v61, %v337_v45  ;;  %v596_v3 = vrot.slane %v1520_v47, 1 }
  0x24   : > { %v382_v48 = vshrl.u32 %v1203_v46, 16  ;;  %v384_v49 = vshll.u32 %v1203_v46, 16 }
  0x25   : > { %1386 = vmatpush3.bf16.msra.mxu0 %v1515_v25  ;;  %v391_v52 = vrot.slane %v389_v50, 1  ;;  %v595_v2 = vrot.slane %v1237_v63, 1  ;;  %v1543_v25 = vld [vmem:[%s1903_s2] sm:$0xff]  }
  0x26   : > { %1406 = vmatpush3.bf16.msra.mxu1 %v1516_v28  ;;  %1387 = vmatprep.subr.bf16.mxu0 %v1565_v1  ;;  %v386_v51 = vrot.slane %v384_v49, 1 }
  0x27   : > { %1407 = vmatprep.subr.bf16.mxu1 %v1565_v1  ;;  %v597_v4 = vsel %vm594_vm11, %v595_v2, %v596_v3  ;;  %v740_v2 = vld [vmem:[#allocation3 + $0x8] sm:$0x1] }
  0x28   : > { %v387_v54 = vor.u32 %v386_v51, %v382_v48 }
  0x29   : > { %1388 = vmatpush3.bf16.msra.mxu0 %v1517_v35 }
  0x2a   : > { %1408 = vmatpush3.bf16.msra.mxu1 %v1518_v39  ;;  %1413 = vmatprep.subr.bf16.mxu0 %v1565_v1  ;;  %v392_v55 = vsel %vm380_vm10, %v387_v54, %v391_v52 }
  0x2b   : > { %1433 = vmatprep.subr.bf16.mxu1 %v1565_v1 }
  0x2c   : > { %1390 = vmatmul.mubr.bf16.vlgmr.msra.gmra.mxu0 %v392_v55 }
  0x2d   : > { %1410 = vmatmul.mubr.bf16.vlgmr.msra.gmra.mxu1 %v1203_v46  ;;  %1414 = vmatpush3.bf16.msra.mxu0 %v1521_v53 }
  0x2e   : > { %1449 = vmatprep.mubr.msk.bf16.mxu1 %vm1566_vm0, %v1565_v1  ;;  %1429 = vmatprep.mubr.msk.bf16.mxu0 %vm1566_vm0, %v1565_v1 }
  0x2f   : > { %1415 = vmatprep.subr.bf16.mxu0 %v1565_v1  ;;  %1434 = vmatpush3.bf16.msra.mxu1 %v1532_v9 }
  0x30   : > { %1435 = vmatprep.subr.bf16.mxu1 %v1565_v1 }
  0x31   : > { %1416 = vmatpush3.bf16.msra.mxu0 %v1522_v56 }
  0x32   : > { %1417 = vmatprep.subr.bf16.mxu0 %v1565_v1 }
  0x33   : > { %1436 = vmatpush3.bf16.msra.mxu1 %v1534_v11 }
  0x34   : > { %1437 = vmatprep.subr.bf16.mxu1 %v1565_v1 }
  0x35   : > { %1418 = vmatpush3.bf16.msra.mxu0 %v1523_v57 }
  0x36   : > { %1419 = vmatprep.subr.bf16.mxu0 %v1565_v1 }
  0x37   : > { %1438 = vmatpush3.bf16.msra.mxu1 %v1536_v19 }
  0x38   : > { %1439 = vmatprep.subr.bf16.mxu1 %v1565_v1 }
  0x39   : > { %1420 = vmatpush3.bf16.msra.mxu0 %v1524_v58 }
  0x3a   : > { %1421 = vmatprep.subr.bf16.mxu0 %v1565_v1 }
  0x3b   : > { %1440 = vmatpush3.bf16.msra.mxu1 %v1538_v17  ;;  %v1549_v17 = vld [vmem:[%s1903_s2 + $0xb0] sm:$0xff]  }
  0x3c   : > { %1441 = vmatprep.subr.bf16.mxu1 %v1565_v1 }
  0x3d   : > { %1422 = vmatpush3.bf16.msra.mxu0 %v1525_v59  ;;  %v736_v59 = vld [vmem:[#allocation3] sm:$0xf] }
  0x3e   : > { %1423 = vmatprep.subr.bf16.mxu0 %v1565_v1 }
  0x3f   : > { %1442 = vmatpush3.bf16.msra.mxu1 %v1540_v22  ;;  %v1551_v22 = vld [vmem:[%s1903_s2 + $0xa0] sm:$0xff]  }
  0x40   : > { %1443 = vmatprep.subr.bf16.mxu1 %v1565_v1 }
  0x41   : > { %1424 = vmatpush3.bf16.msra.mxu0 %v1526_v60 }
  0x42   : > { %1425 = vmatprep.subr.bf16.mxu0 %v1565_v1 }
  0x43   : > { %1444 = vmatpush3.bf16.msra.mxu1 %v1542_v24  ;;  %v1553_v24 = vld [vmem:[%s1903_s2 + $0x90] sm:$0xff]  }
  0x44   : > { %1445 = vmatprep.subr.bf16.mxu1 %v1565_v1 }
  0x45   : > { %1426 = vmatpush3.bf16.msra.mxu0 %v1527_v62 }
  0x46   : > { %1427 = vmatprep.subr.bf16.mxu0 %v1565_v1 }
  0x47   : > { %1446 = vmatpush3.bf16.msra.mxu1 %v1544_v26 }
  0x48   : > { %1447 = vmatprep.subr.bf16.mxu1 %v1565_v1 }
  0x49   : > { %1428 = vmatpush3.bf16.msra.mxu0 %v1528_v0 }
  0x4a   : > { %1453 = vmatprep.subr.bf16.mxu0 %v1565_v1 }
  0x4b   : > { %1448 = vmatpush3.bf16.msra.mxu1 %v1546_v27 }
  0x4c   : > { %1430 = vmatmul.mubr.bf16.vlgmr.msra.gmra.mxu0 %v597_v4  ;;  %1473 = vmatprep.subr.bf16.mxu1 %v1565_v1 }
  0x4d   : > { %1469 = vmatprep.mubr.msk.bf16.mxu0 %vm1566_vm0, %v1565_v1  ;;  %1454 = vmatpush3.bf16.msra.mxu0 %v1530_v7 }
  0x4e   : > { %1455 = vmatprep.subr.bf16.mxu0 %v1565_v1 }
  0x51   : > { %1456 = vmatpush3.bf16.msra.mxu0 %v1531_v8 }
  0x52   : > { %1457 = vmatprep.subr.bf16.mxu0 %v1565_v1 }
  0x55   : > { %1458 = vmatpush3.bf16.msra.mxu0 %v1533_v10 }
  0x56   : > { %1459 = vmatprep.subr.bf16.mxu0 %v1565_v1 }
  0x59   : > { %1460 = vmatpush3.bf16.msra.mxu0 %v1535_v14 }
  0x5a   : > { %1461 = vmatprep.subr.bf16.mxu0 %v1565_v1 }
  0x5d   : > { %1462 = vmatpush3.bf16.msra.mxu0 %v1537_v20 }
  0x5e   : > { %1463 = vmatprep.subr.bf16.mxu0 %v1565_v1 }
  0x61   : > { %1464 = vmatpush3.bf16.msra.mxu0 %v1539_v21  ;;  %v1550_v21 = vld [vmem:[%s1903_s2 + $0xa8] sm:$0xff]  }
  0x62   : > { %1465 = vmatprep.subr.bf16.mxu0 %v1565_v1 }
  0x65   : > { %1466 = vmatpush3.bf16.msra.mxu0 %v1541_v23  ;;  %v1552_v23 = vld [vmem:[%s1903_s2 + $0x98] sm:$0xff]  }
  0x66   : > { %1467 = vmatprep.subr.bf16.mxu0 %v1565_v1 }
  0x69   : > { %1468 = vmatpush3.bf16.msra.mxu0 %v1543_v25  ;;  %v1554_v25 = vld [vmem:[%s1903_s2 + $0x88] sm:$0xff]  }
  0xec   : > { %v476_v33 = vpop.f32.mrf.mxu0 }
  0xed   : > { %v566_v28 = vpop.f32.mrf.mxu1 }
  0xee   : > { %v1391_v35 = vpop.f32.mrf.mxu0  ;;  %v567_v38 = vadd.f32 %v566_v28, %v476_v33  ;;  %v1555_v28 = vld [vmem:[%s1903_s2 + $0x80] sm:$0xff]  }
  0xef   : > { %v1411_v29 = vpop.f32.mrf.mxu1 }
  0xf0   : > { %v479_v36 = vpop.f32.mrf.mxu0 }
  0xf1   : > { %v569_v31 = vpop.f32.mrf.mxu1 }
  0xf2   : > { %v1392_v37 = vpop.f32.mrf.mxu0  ;;  %v570_v44 = vadd.f32 %v569_v31, %v479_v36 }
  0xf3   : > { %v1412_v32 = vpop.f32.mrf.mxu1 }
 0x10c   : > { %v681_v39 = vpop.f32.mrf.mxu0 }
 0x10d   : > { %v688_v41 = vadd.f32 %v681_v39, %v567_v38 }
 0x10e   : > { %v1431_v43 = vpop.f32.mrf.mxu0 }
 0x10f   : > { %v697_v45 = vmul.f32 %v1246_v40, %v688_v41 }
 0x110   : > { %v684_v46 = vpop.f32.mrf.mxu0 }
 0x111   : > { %v706_v47 = vadd.f32 %v1247_v42, %v697_v45  ;;  %v689_v48 = vadd.f32 %v684_v46, %v570_v44  ;;  %v1310_v45 = vld [vmem:[%s1907_s6] ss:$0 sm:$0xff] }
 0x112   : > { %v1432_v49 = vpop.f32.mrf.mxu0 }
 0x113   : > { %v708_v50 = vmax.f32 %v706_v47, 0.0  ;;  %v698_v51 = vmul.f32 %v1246_v40, %v689_v48 }
 0x115   : > { %v1317_v52 = vpack.c.bf16 %v708_v50, %v708_v50  ;;  %v707_v53 = vadd.f32 %v1247_v42, %v698_v51 }
 0x117   : > { %v717_v54 = vshrl.u32 %v1317_v52, 16  ;;  %v709_v55 = vmax.f32 %v707_v53, 0.0  ;;  %v720_v57 = vshll.u32 %v1317_v52, 16 }
 0x119   : > { %v719_v56 = vrot.slane %v717_v54, 7  ;;  %v1318_v58 = vpack.c.bf16 %v709_v55, %v709_v55 }
 0x11b   : > { %v722_v60 = vor.u32 %v720_v57, %v719_v56  ;;  %v725_v61 = vshrl.u32 %v1318_v58, 16  ;;  %v728_v0 = vshll.u32 %v1318_v58, 16  ;;  %v723_v3 = vrot.slane %v719_v56, 4 }
 0x11d   : > { %v737_v62 = vsel %vm1711_vm9, %v722_v60, %v736_v59  ;;  %v727_v63 = vrot.slane %v725_v61, 7 }
 0x11e   : > { %738 = vst [vmem:[#allocation3] sm:$0xf] %v737_v62 }
 0x11f   : > { %v730_v4 = vor.u32 %v728_v0, %v727_v63  ;;  %v732_v5 = vrot.slane %v727_v63, 4 }
 0x121   : > { %v731_v6 = vsel %vm1705_vm8, %v723_v3, %v730_v4  ;;  %v741_v7 = vsel %vm1671_vm4, %v732_v5, %v740_v2 }
 0x122   : > { %739 = vst [vmem:[#allocation3 + $0x4] sm:$0xf] %v731_v6  ;;  %742 = vst [vmem:[#allocation3 + $0x8] sm:$0x1] %v741_v7 }
 0x125   : > { %v743_v8 = vld [vmem:[#allocation3] sm:$0xf] }
 0x126   : > { %v979_v26 = vld [vmem:[#allocation3] sm:$0xe] }
 0x129   : > { %v744_v9 = vld [vmem:[#allocation3 + $0x4] sm:$0xf]  ;;  %v1547_v34 = vld [vmem:[#allocation3 + $0x8] ss:$0 sps:$4 sm:$0x11]  }
 0x12a   : > { %v1266_v10 = vcombine.low %v743_v8, %v744_v9  ;;  %v795_v12 = vshll.u32 %v1547_v34, 16  ;;  %v1300_v27 = vcombine.low %v979_v26, %v744_v9  ;;  %v1001_v31 = vrot.slane %v1547_v34, 1 }
 0x12c   : > { %1470 = vmatmul.mubr.bf16.vlgmr.msra.gmra.mxu0 %v1266_v10  ;;  %v790_v11 = vshll.u32 %v1266_v10, 16  ;;  %v788_v14 = vshrl.u32 %v1266_v10, 16  ;;  %v797_v20 = vrot.slane %v795_v12, 1  ;;  %v1000_v29 = vrot.slane %v1300_v27, 1 }
 0x12e   : > { %v792_v16 = vrot.slane %v790_v11, 1  ;;  %v1002_v32 = vsel %vm594_vm11, %v1000_v29, %v1001_v31 }
 0x130   : > { %v793_v19 = vor.u32 %v792_v16, %v788_v14 }
 0x132   : > { %v798_v13 = vsel %vm380_vm10, %v793_v19, %v797_v20 }
 0x133   : > { %1450 = vmatmul.mubr.bf16.vlgmr.msra.gmra.mxu1 %v798_v13 }
 0x134   : > { %1474 = vmatpush3.bf16.msra.mxu1 %v1548_v30  ;;  %1489 = vmatprep.mubr.msk.bf16.mxu1 %vm1566_vm0, %v1565_v1 }
 0x135   : > { %1475 = vmatprep.subr.bf16.mxu1 %v1565_v1 }
 0x138   : > { %1476 = vmatpush3.bf16.msra.mxu1 %v1549_v17 }
 0x139   : > { %1477 = vmatprep.subr.bf16.mxu1 %v1565_v1 }
 0x13c   : > { %1478 = vmatpush3.bf16.msra.mxu1 %v1550_v21 }
 0x13d   : > { %1479 = vmatprep.subr.bf16.mxu1 %v1565_v1 }
 0x140   : > { %1480 = vmatpush3.bf16.msra.mxu1 %v1551_v22 }
 0x141   : > { %1481 = vmatprep.subr.bf16.mxu1 %v1565_v1 }
 0x144   : > { %1482 = vmatpush3.bf16.msra.mxu1 %v1552_v23 }
 0x145   : > { %1483 = vmatprep.subr.bf16.mxu1 %v1565_v1 }
 0x148   : > { %1484 = vmatpush3.bf16.msra.mxu1 %v1553_v24 }
 0x149   : > { %1485 = vmatprep.subr.bf16.mxu1 %v1565_v1 }
 0x14c   : > { %1486 = vmatpush3.bf16.msra.mxu1 %v1554_v25 }
 0x14d   : > { %1487 = vmatprep.subr.bf16.mxu1 %v1565_v1  ;;  %v1309_v1 = vld [vmem:[%s1906_s5] ss:$0 sm:$0xff] }
 0x150   : > { %1488 = vmatpush3.bf16.msra.mxu1 %v1555_v28 }
 0x153   : > { %1490 = vmatmul.mubr.bf16.vlgmr.msra.gmra.mxu1 %v1002_v32 }
 0x1ec   : > { %v972_v33 = vpop.f32.mrf.mxu0 }
 0x1ee   : > { %v1471_v35 = vpop.f32.mrf.mxu0 }
 0x1f0   : > { %v975_v36 = vpop.f32.mrf.mxu0 }
 0x1f2   : > { %v1472_v37 = vpop.f32.mrf.mxu0 }
 0x1f3   : > { %v882_v38 = vpop.f32.mrf.mxu1 }
 0x1f4   : > { %v973_v42 = vadd.f32 %v972_v33, %v882_v38 }
 0x1f5   : > { %v1451_v39 = vpop.f32.mrf.mxu1 }
 0x1f7   : > { %v885_v40 = vpop.f32.mrf.mxu1 }
 0x1f8   : > { %v976_v47 = vadd.f32 %v975_v36, %v885_v40 }
 0x1f9   : > { %v1452_v41 = vpop.f32.mrf.mxu1 }
 0x213   : > { %v1086_v43 = vpop.f32.mrf.mxu1 }
 0x214   : > { %v1093_v44 = vadd.f32 %v1086_v43, %v973_v42 }
 0x215   : > { %v1491_v46 = vpop.f32.mrf.mxu1 }
 0x216   : > { %v1102_v48 = vmul.f32 %v1309_v1, %v1093_v44 }
 0x217   : > { %v1089_v49 = vpop.f32.mrf.mxu1 }
 0x218   : > { %v1111_v50 = vadd.f32 %v1310_v45, %v1102_v48  ;;  %v1094_v51 = vadd.f32 %v1089_v49, %v976_v47 }
 0x219   : > { %v1492_v52 = vpop.f32.mrf.mxu1 }
 0x21a   : > { %v1115_v53 = vadd.f32 %v1111_v50, %v1675_v15  ;;  %v1103_v54 = vmul.f32 %v1309_v1, %v1094_v51 }
 0x21c   : > { %v1117_v55 = vmax.f32 %v1115_v53, 0.0  ;;  %v1112_v56 = vadd.f32 %v1310_v45, %v1103_v54 }
 0x21e   : > { %1119 = vst [vmem:[%s278_s12] sm:$0xff] %v1117_v55  ;;  %v1116_v57 = vadd.f32 %v1112_v56, %v1684_v18 }
 0x220   : > { %v1118_v58 = vmax.f32 %v1116_v57, 0.0 }
 0x222   : > { %1120 = vst [vmem:[%s278_s12 + $0x8] sm:$0xff] %v1118_v58 }
 0x223 PF: > { %s17_s24 = sadd.s32 1, %s1563_s24  }
 0x224   : > { %p14_p4 = scmp.ge.s32.totalorder %s17_s24, 4  }
 0x226   :  { %16 = sbr.rel (!%p14_p4) target bundleno = 1 (0x1), region = 82 }

</bundles_post_ra>
